<compile_context>
chip_gen: v6e
topology: v6e:2x2x1
jax: 0.10.0
libtpu: 0.0.40
codegen_flags: <defaults>
</compile_context>

<pallas_src>
import functools

import jax
import jax.numpy as jnp
from jax import lax
from jax.experimental import pallas as pl
from jax.experimental.pallas import tpu as pltpu


# ----------------------------------------------------------------------------
# In-kernel helpers
# ----------------------------------------------------------------------------
def _softplus(x):
    # PyTorch nn.Softplus(beta=1, threshold=20)
    return jnp.where(x > 20.0, x, jnp.log1p(jnp.exp(jnp.minimum(x, 20.0))))


# ----------------------------------------------------------------------------
# Pallas kernel: full Cnn_bar forward for one batch tile (batch on lanes)
# ----------------------------------------------------------------------------
def _cnn_bar_kernel(x_ref,      # VMEM (81, TB)  flattened 9x9 images, batch on lanes
                    wc_ref,     # VMEM (64, 81)  folded conv3∘conv2 weight (transposed)
                    bc_ref,     # VMEM (1, 1)    composite conv bias
                    w1_ref,     # VMEM (16, 64)  lin1 weight
                    b1_ref,     # VMEM (16, 1)   lin1 bias
                    wl3_ref,    # VMEM (16, 1)   lin3 weight (transposed)
                    bl3_ref,    # VMEM (1, 1)    lin3 bias
                    out_ref):   # VMEM (1, TB)
    x = x_ref[...]                                                      # (81, TB)

    # Folded conv3 ∘ conv2 as a single MXU matmul (K=81, N=TB).
    z = jnp.dot(wc_ref[...], x, preferred_element_type=jnp.float32)     # (64, TB)
    h = _softplus(z + bc_ref[...])

    # lin1 (64 -> 16) as one MXU matmul (K=64, N=TB).
    a = jnp.dot(w1_ref[...], h, preferred_element_type=jnp.float32)     # (16, TB)
    a = _softplus(a + b1_ref[...])

    # lin3 (16 -> 1): VPU broadcast-multiply + 16-row sublane reduce
    # (lane-dense result; avoids an N=1 MXU matmul).
    o = jnp.sum(wl3_ref[...] * a, axis=0, keepdims=True) + bl3_ref[...]  # (1, TB)
    out_ref[...] = _softplus(o) * 1.0e8


# ----------------------------------------------------------------------------
# Wrapper-side glue: fold the two convolutions into one (81, 64) matrix
# ----------------------------------------------------------------------------
def _fold_convs(w3, b3, w2, b2):
    """conv3 (3x3, pad=1) ∘ conv2 (2x2, valid)  ==  x81 @ Wc + bc."""
    dn = ('NCHW', 'OIHW', 'NCHW')
    eye = jnp.eye(81, dtype=jnp.float32).reshape(81, 1, 9, 9)   # basis images
    y = lax.conv_general_dilated(eye, w3.reshape(1, 1, 3, 3).astype(jnp.float32),
                                 (1, 1), ((1, 1), (1, 1)), dimension_numbers=dn)
    z = lax.conv_general_dilated(y, w2.reshape(1, 1, 2, 2).astype(jnp.float32),
                                 (1, 1), 'VALID', dimension_numbers=dn)
    Wc = z.reshape(81, 64)                               # Wc[in_flat, out_flat]
    bc = b3.reshape(()) * jnp.sum(w2) + b2.reshape(())   # b3 uniform over 2x2 window
    return Wc, bc


# ----------------------------------------------------------------------------
# Public forward
# ----------------------------------------------------------------------------
@functools.partial(jax.jit, static_argnames=("block_b",))
def cnn_bar_forward(x, params, block_b=512):
    """x: (B, 1, 9, 9) float32 (NCHW).  Returns (B,) float32."""
    w3, b3, w2, b2, W1, b1, Wl3, bl3 = params
    B = x.shape[0]

    # Lane-dense batch tile: multiple of 128, at most `block_b`.
    block_b = max(128, (block_b // 128) * 128)
    TB = min(block_b, pl.cdiv(B, 128) * 128)
    Bp = pl.cdiv(B, TB) * TB

    # Glue: flatten, put batch on lanes, pad batch to a multiple of TB.
    x_fm = x.reshape(B, 81).astype(jnp.float32).T                 # (81, B)
    x_fm = jnp.pad(x_fm, ((0, 0), (0, Bp - B)))                   # (81, Bp)

    # Glue: fold convs + reshape params for the feature-major layout.
    Wc, bc = _fold_convs(w3, b3, w2, b2)
    wcT  = Wc.T                                                   # (64, 81)
    w1   = W1.astype(jnp.float32)                                 # (16, 64)
    b1c  = b1.reshape(16, 1).astype(jnp.float32)                  # (16, 1)
    wl3c = Wl3.reshape(16, 1).astype(jnp.float32)                 # (16, 1)
    bcm  = bc.reshape(1, 1).astype(jnp.float32)                   # (1, 1)
    bl3m = bl3.reshape(1, 1).astype(jnp.float32)                  # (1, 1)

    def resident(shape):  # weights: same block every grid step -> stay in VMEM
        return pl.BlockSpec(shape, lambda i: (0, 0))

    out = pl.pallas_call(
        _cnn_bar_kernel,
        out_shape=jax.ShapeDtypeStruct((1, Bp), jnp.float32),
        grid=(Bp // TB,),
        in_specs=[
            pl.BlockSpec((81, TB), lambda i: (0, i)),   # x tile
            resident((64, 81)),                         # folded conv weight
            resident((1, 1)),                           # composite conv bias
            resident((16, 64)),                         # lin1 weight
            resident((16, 1)),                          # lin1 bias
            resident((16, 1)),                          # lin3 weight
            resident((1, 1)),                           # lin3 bias
        ],
        out_specs=pl.BlockSpec((1, TB), lambda i: (0, i)),
        compiler_params=pltpu.CompilerParams(
            dimension_semantics=("parallel",)),
    )(x_fm, wcT, bcm, w1, b1c, wl3c, bl3m)

    return out[0, :B]


# ----------------------------------------------------------------------------
# Pure-JAX reference (mirrors the PyTorch forward exactly)
# ----------------------------------------------------------------------------
def cnn_bar_reference(x, params):
    w3, b3, w2, b2, W1, b1, Wl3, bl3 = params
    dn = ('NCHW', 'OIHW', 'NCHW')
    y = lax.conv_general_dilated(x, w3.reshape(1, 1, 3, 3), (1, 1),
                                 ((1, 1), (1, 1)), dimension_numbers=dn) + b3
    z = lax.conv_general_dilated(y, w2.reshape(1, 1, 2, 2), (1, 1),
                                 'VALID', dimension_numbers=dn) + b2
    h = jax.nn.softplus(z).reshape(x.shape[0], -1)            # (B, 64)
    a = jax.nn.softplus(h @ W1.T + b1)                        # (B, 16)
    o = jax.nn.softplus(a @ Wl3.T + bl3) * 1.0e8              # (B, 1)
    return o.reshape(-1)


# ----------------------------------------------------------------------------
# Deterministic parameter init (shapes from Cnn_bar.__init__)
# ----------------------------------------------------------------------------
def init_params(key):
    ks = jax.random.split(key, 8)
    f32 = jnp.float32
    w3  = 0.1 * jax.random.normal(ks[0], (1, 1, 3, 3), f32)   # conv3 weight
    b3  = 0.1 * jax.random.normal(ks[1], (1,), f32)           # conv3 bias
    w2  = 0.1 * jax.random.normal(ks[2], (1, 1, 2, 2), f32)   # conv2 weight
    b2  = 0.1 * jax.random.normal(ks[3], (1,), f32)           # conv2 bias
    W1  = 0.1 * jax.random.normal(ks[4], (16, 64), f32)       # lin1 weight
    b1  = 0.1 * jax.random.normal(ks[5], (16,), f32)          # lin1 bias
    Wl3 = 0.1 * jax.random.normal(ks[6], (1, 16), f32)        # lin3 weight
    bl3 = 0.1 * jax.random.normal(ks[7], (1,), f32)           # lin3 bias
    return (w3, b3, w2, b2, W1, b1, Wl3, bl3)


if __name__ == "__main__":
    key = jax.random.PRNGKey(0)
    kx, kp = jax.random.split(key)
    params = init_params(kp)

    # lin1 expects 64 flattened features => input spatial must be 9x9, C=1.
    B = 2
    x = jax.random.normal(kx, (B, 1, 9, 9), jnp.float32)

    out = jax.block_until_ready(cnn_bar_forward(x, params))
    ref = jax.block_until_ready(cnn_bar_reference(x, params))
    assert out.shape == (B,)
    assert jnp.allclose(out, ref, rtol=1e-4, atol=1.0), (out, ref)

    # Exercise the multi-tile grid + batch-padding path as well.
    B2 = 200
    x2 = jax.random.normal(kx, (B2, 1, 9, 9), jnp.float32)
    out2 = jax.block_until_ready(cnn_bar_forward(x2, params, block_b=128))
    ref2 = jax.block_until_ready(cnn_bar_reference(x2, params))
    assert out2.shape == (B2,)
    assert jnp.allclose(out2, ref2, rtol=1e-4, atol=1.0)

    print("KERNEL_OK")
</pallas_src>

<mosaic_0001>
module attributes {stable_mosaic.version = 11 : i64} {
  func.func @_cnn_bar_kernel(%arg0: i32, %arg1: memref<81x128xf32, #tpu.memory_space<vmem>>, %arg2: memref<64x81xf32, #tpu.memory_space<vmem>>, %arg3: memref<1x1xf32, #tpu.memory_space<vmem>>, %arg4: memref<16x64xf32, #tpu.memory_space<vmem>>, %arg5: memref<16x1xf32, #tpu.memory_space<vmem>>, %arg6: memref<16x1xf32, #tpu.memory_space<vmem>>, %arg7: memref<1x1xf32, #tpu.memory_space<vmem>>, %arg8: memref<1x128xf32, #tpu.memory_space<vmem>>) attributes {dimension_semantics = [#tpu.dimension_semantics<parallel>], iteration_bounds = array<i64: 1>, scalar_prefetch = 0 : i64, scratch_operands = 0 : i64, tpu.core_type = #tpu.core_type<tc>, window_params = [{transform_indices = @transform_0, window_bounds = array<i64: 81, 128>}, {pipeline_mode = #tpu.pipeline_mode<synchronous>, transform_indices = @transform_1, window_bounds = array<i64: 64, 81>}, {pipeline_mode = #tpu.pipeline_mode<synchronous>, transform_indices = @transform_2, window_bounds = array<i64: 1, 1>}, {pipeline_mode = #tpu.pipeline_mode<synchronous>, transform_indices = @transform_3, window_bounds = array<i64: 16, 64>}, {pipeline_mode = #tpu.pipeline_mode<synchronous>, transform_indices = @transform_4, window_bounds = array<i64: 16, 1>}, {pipeline_mode = #tpu.pipeline_mode<synchronous>, transform_indices = @transform_5, window_bounds = array<i64: 16, 1>}, {pipeline_mode = #tpu.pipeline_mode<synchronous>, transform_indices = @transform_6, window_bounds = array<i64: 1, 1>}, {transform_indices = @transform_7, window_bounds = array<i64: 1, 128>}]} {
    %c0 = arith.constant 0 : index
    %c0_0 = arith.constant 0 : index
    %0 = vector.load %arg1[%c0, %c0_0] : memref<81x128xf32, #tpu.memory_space<vmem>>, vector<81x128xf32>
    %c0_1 = arith.constant 0 : index
    %c0_2 = arith.constant 0 : index
    %1 = vector.load %arg2[%c0_1, %c0_2] : memref<64x81xf32, #tpu.memory_space<vmem>>, vector<64x81xf32>
    %cst = arith.constant dense<0.000000e+00> : vector<64x128xf32>
    %2 = tpu.matmul %1, %0, %cst {dimension_numbers = #tpu.dot_dimension_numbers<[1], [0], [0], [1], [0, 0, 1, 1], [], []>} : vector<64x81xf32>, vector<81x128xf32>, vector<64x128xf32> -> vector<64x128xf32>
    %c0_3 = arith.constant 0 : index
    %c0_4 = arith.constant 0 : index
    %3 = vector.load %arg3[%c0_3, %c0_4] : memref<1x1xf32, #tpu.memory_space<vmem>>, vector<1x1xf32>
    %4 = vector.broadcast %3 : vector<1x1xf32> to vector<64x128xf32>
    %5 = arith.addf %2, %4 : vector<64x128xf32>
    %cst_5 = arith.constant 2.000000e+01 : f32
    %6 = vector.broadcast %cst_5 : f32 to vector<64x128xf32>
    %7 = arith.cmpf ogt, %5, %6 : vector<64x128xf32>
    %cst_6 = arith.constant 2.000000e+01 : f32
    %8 = vector.broadcast %cst_6 : f32 to vector<64x128xf32>
    %9 = arith.minimumf %5, %8 : vector<64x128xf32>
    %10 = math.exp %9 : vector<64x128xf32>
    %11 = math.log1p %10 : vector<64x128xf32>
    %12 = arith.select %7, %5, %11 : vector<64x128xi1>, vector<64x128xf32>
    %c0_7 = arith.constant 0 : index
    %c0_8 = arith.constant 0 : index
    %13 = vector.load %arg4[%c0_7, %c0_8] : memref<16x64xf32, #tpu.memory_space<vmem>>, vector<16x64xf32>
    %cst_9 = arith.constant dense<0.000000e+00> : vector<16x128xf32>
    %14 = tpu.matmul %13, %12, %cst_9 {dimension_numbers = #tpu.dot_dimension_numbers<[1], [0], [0], [1], [0, 0, 1, 1], [], []>} : vector<16x64xf32>, vector<64x128xf32>, vector<16x128xf32> -> vector<16x128xf32>
    %c0_10 = arith.constant 0 : index
    %c0_11 = arith.constant 0 : index
    %15 = vector.load %arg5[%c0_10, %c0_11] : memref<16x1xf32, #tpu.memory_space<vmem>>, vector<16x1xf32>
    %16 = vector.broadcast %15 : vector<16x1xf32> to vector<16x128xf32>
    %17 = arith.addf %14, %16 : vector<16x128xf32>
    %cst_12 = arith.constant 2.000000e+01 : f32
    %18 = vector.broadcast %cst_12 : f32 to vector<16x128xf32>
    %19 = arith.cmpf ogt, %17, %18 : vector<16x128xf32>
    %cst_13 = arith.constant 2.000000e+01 : f32
    %20 = vector.broadcast %cst_13 : f32 to vector<16x128xf32>
    %21 = arith.minimumf %17, %20 : vector<16x128xf32>
    %22 = math.exp %21 : vector<16x128xf32>
    %23 = math.log1p %22 : vector<16x128xf32>
    %24 = arith.select %19, %17, %23 : vector<16x128xi1>, vector<16x128xf32>
    %c0_14 = arith.constant 0 : index
    %c0_15 = arith.constant 0 : index
    %25 = vector.load %arg6[%c0_14, %c0_15] : memref<16x1xf32, #tpu.memory_space<vmem>>, vector<16x1xf32>
    %26 = vector.broadcast %25 : vector<16x1xf32> to vector<16x128xf32>
    %27 = arith.mulf %26, %24 : vector<16x128xf32>
    %cst_16 = arith.constant dense<0.000000e+00> : vector<128xf32>
    %28 = vector.multi_reduction <add>, %27, %cst_16 [0] : vector<16x128xf32> to vector<128xf32>
    %29 = vector.shape_cast %28 : vector<128xf32> to vector<1x128xf32>
    %c0_17 = arith.constant 0 : index
    %c0_18 = arith.constant 0 : index
    %30 = vector.load %arg7[%c0_17, %c0_18] : memref<1x1xf32, #tpu.memory_space<vmem>>, vector<1x1xf32>
    %31 = vector.broadcast %30 : vector<1x1xf32> to vector<1x128xf32>
    %32 = arith.addf %29, %31 : vector<1x128xf32>
    %cst_19 = arith.constant 2.000000e+01 : f32
    %33 = vector.broadcast %cst_19 : f32 to vector<1x128xf32>
    %34 = arith.cmpf ogt, %32, %33 : vector<1x128xf32>
    %cst_20 = arith.constant 2.000000e+01 : f32
    %35 = vector.broadcast %cst_20 : f32 to vector<1x128xf32>
    %36 = arith.minimumf %32, %35 : vector<1x128xf32>
    %37 = math.exp %36 : vector<1x128xf32>
    %38 = math.log1p %37 : vector<1x128xf32>
    %39 = arith.select %34, %32, %38 : vector<1x128xi1>, vector<1x128xf32>
    %cst_21 = arith.constant 1.000000e+08 : f32
    %40 = vector.broadcast %cst_21 : f32 to vector<1x128xf32>
    %41 = arith.mulf %39, %40 : vector<1x128xf32>
    %c0_22 = arith.constant 0 : index
    %c0_23 = arith.constant 0 : index
    %42 = vector.load %arg8[%c0_22, %c0_23] : memref<1x128xf32, #tpu.memory_space<vmem>>, vector<1x128xf32>
    tpu.vector_store %arg8[%c0_22, %c0_23], %41 {strides = array<i32>} : memref<1x128xf32, #tpu.memory_space<vmem>>, vector<1x128xf32>,
    return
  }
  func.func @transform_0(%arg0: i32) -> (i32, i32) {
    %c0_i32 = arith.constant 0 : i32
    %c0_i32_0 = arith.constant 0 : i32
    return %c0_i32, %arg0 : i32, i32
  }
  func.func @transform_1(%arg0: i32) -> (i32, i32) {
    %c0_i32 = arith.constant 0 : i32
    %c0_i32_0 = arith.constant 0 : i32
    %c0_i32_1 = arith.constant 0 : i32
    return %c0_i32, %c0_i32_0 : i32, i32
  }
  func.func @transform_2(%arg0: i32) -> (i32, i32) {
    %c0_i32 = arith.constant 0 : i32
    %c0_i32_0 = arith.constant 0 : i32
    %c0_i32_1 = arith.constant 0 : i32
    return %c0_i32, %c0_i32_0 : i32, i32
  }
  func.func @transform_3(%arg0: i32) -> (i32, i32) {
    %c0_i32 = arith.constant 0 : i32
    %c0_i32_0 = arith.constant 0 : i32
    %c0_i32_1 = arith.constant 0 : i32
    return %c0_i32, %c0_i32_0 : i32, i32
  }
  func.func @transform_4(%arg0: i32) -> (i32, i32) {
    %c0_i32 = arith.constant 0 : i32
    %c0_i32_0 = arith.constant 0 : i32
    %c0_i32_1 = arith.constant 0 : i32
    return %c0_i32, %c0_i32_0 : i32, i32
  }
  func.func @transform_5(%arg0: i32) -> (i32, i32) {
    %c0_i32 = arith.constant 0 : i32
    %c0_i32_0 = arith.constant 0 : i32
    %c0_i32_1 = arith.constant 0 : i32
    return %c0_i32, %c0_i32_0 : i32, i32
  }
  func.func @transform_6(%arg0: i32) -> (i32, i32) {
    %c0_i32 = arith.constant 0 : i32
    %c0_i32_0 = arith.constant 0 : i32
    %c0_i32_1 = arith.constant 0 : i32
    return %c0_i32, %c0_i32_0 : i32, i32
  }
  func.func @transform_7(%arg0: i32) -> (i32, i32) {
    %c0_i32 = arith.constant 0 : i32
    %c0_i32_0 = arith.constant 0 : i32
    return %c0_i32, %arg0 : i32, i32
  }
}

</mosaic_0001>

<bundles_post_ra>
// kernel: cnn_bar_forward.1
= control target key start
LH: loop header
LB: loop body
LE: loop exit
PB: predicated region body
PF: predicated region fallthrough
CT: control target
= control target key end

     0   :  { %vm84_vm0 = vcmask 1040384   ;;  %v622_v2 = vmov 0   ;;  %vm59_vm1 = vcmask 662528   ;;  %vm319_vm2 = vcmask 523264   ;;  %s855_s0 = inlined_call_operand.vmem [shape: f32[81,128], index: 0, kind: input, shape index: {}]   ;;  %s856_s2 = inlined_call_operand.<no memory space> [shape: f32[1,1], index: 2, kind: input, shape index: {}]   ;;  %s857_s1 = inlined_call_operand.vmem [shape: f32[64,81], index: 1, kind: input, shape index: {}]   ;;  %s858_s4 = inlined_call_operand.vmem [shape: f32[16,1], index: 4, kind: input, shape index: {}]   ;;  %s859_s5 = inlined_call_operand.vmem [shape: f32[16,1], index: 5, kind: input, shape index: {}]   ;;  %s860_s3 = inlined_call_operand.vmem [shape: f32[16,64], index: 3, kind: input, shape index: {}]   ;;  %s861_s6 = inlined_call_operand.<no memory space> [shape: f32[1,1], index: 6, kind: input, shape index: {}]   ;;  %s862_s7 = inlined_call_operand.vmem [shape: f32[1,128], index: 7, kind: output, shape index: {}]  }
   0x1   :  { %v40_v0 = vld [vmem:[%s855_s0 + $0x50] sm:$0x1]  ;;  %v39_v1 = vld [vmem:[%s855_s0 + $0x48] sm:$0xff]  ;;  %576 = vset.pattern.permute.xlu0 %v622_v2  ;;  %v12_v3 = vstv %s856_s2  ;;  %577 = vset.pattern.permute.xlu1 %v622_v2  ;;  %v38_v4 = vld [vmem:[%s855_s0 + $0x40] sm:$0xff] }
   0x2   :  { %522 = vmatprep.subr.msk.mxu0 %vm84_vm0, %v40_v0  ;;  %13 = vst [vmem:[#allocation2] sm:$0x1] %v12_v3  ;;  %v41_v5 = vld [vmem:[%s857_s1] sm:$0xff]  ;;  %v37_v6 = vld [vmem:[%s855_s0 + $0x38] sm:$0xff]  ;;  %v36_v7 = vld [vmem:[%s855_s0 + $0x30] sm:$0xff]  ;;  %v14_v26 = vstv %s861_s6 }
   0x3   :  { %523 = vmatpush3.msk.msra.mxu0 %vm84_vm0, %v40_v0  ;;  %544 = vmatprep.mubr.msk.f32.mxu0 %vm59_vm1, %v41_v5  ;;  %v35_v8 = vld [vmem:[%s855_s0 + $0x28] sm:$0xff]  ;;  %v34_v10 = vld [vmem:[%s855_s0 + $0x20] sm:$0xff]  ;;  %v33_v12 = vld [vmem:[%s855_s0 + $0x18] sm:$0xff]  ;;  %15 = vst [vmem:[#allocation3] sm:$0x1] %v14_v26 }
   0x4   :  { %524 = vmatprep.subr.mxu0 %v39_v1  ;;  %v307_v11 = vld [vmem:[%s858_s4] sm:$0xff]  ;;  %v32_v13 = vld [vmem:[%s855_s0 + $0x10] sm:$0xff]  ;;  %v430_v14 = vld [vmem:[%s859_s5 + $0x8] sm:$0xff] }
   0x5   :  { %525 = vmatpush3.msra.mxu0 %v39_v1  ;;  %v31_v15 = vld [vmem:[%s855_s0 + $0x8] sm:$0xff]  ;;  %v30_v16 = vld [vmem:[%s855_s0] sm:$0xff]  ;;  %v43_v18 = vld [vmem:[%s857_s1 + $0x10] sm:$0xff] }
   0x6   :  { %526 = vmatprep.subr.mxu0 %v38_v4  ;;  %v42_v17 = vld [vmem:[%s857_s1 + $0x8] sm:$0xff]  ;;  %v44_v19 = vld [vmem:[%s857_s1 + $0x18] sm:$0xff]  ;;  %v45_v20 = vld [vmem:[%s857_s1 + $0x20] sm:$0xff] }
   0x7   :  { %527 = vmatpush3.msra.mxu0 %v38_v4  ;;  %v46_v21 = vld [vmem:[%s857_s1 + $0x28] sm:$0xff]  ;;  %v47_v22 = vld [vmem:[%s857_s1 + $0x30] sm:$0xff]  ;;  %v48_v23 = vld [vmem:[%s857_s1 + $0x38] sm:$0xff] }
   0x8   :  { %528 = vmatprep.subr.mxu0 %v37_v6  ;;  %v305_v24 = vld [vmem:[%s860_s3] sm:$0xff]  ;;  %v308_v25 = vld [vmem:[%s858_s4 + $0x8] sm:$0xff] }
   0x9   :  { %529 = vmatpush3.msra.mxu0 %v37_v6  ;;  %v481_v9 = vld [vmem:[#allocation2] ss:$0 sm:$0xff]  ;;  %572 = vmatprep.mubr.msk.f32.mxu1 %vm319_vm2, %v305_v24 }
   0xa   :  { %530 = vmatprep.subr.mxu0 %v36_v7  ;;  %56 = vperm.xlu0 %576, %v481_v9   ;;  %v429_v27 = vld [vmem:[%s859_s5] sm:$0xff] }
   0xb   :  { %531 = vmatpush3.msra.mxu0 %v36_v7  ;;  %316 = vperm.xlu1 %577, %v308_v25   ;;  %v450_v28 = vld [vmem:[#allocation3] sm:$0x1] }
   0xc   :  { %532 = vmatprep.subr.mxu0 %v35_v8 }
   0xd   :  { %533 = vmatpush3.msra.mxu0 %v35_v8 }
   0xe   :  { %534 = vmatprep.subr.mxu0 %v34_v10  ;;  %311 = vperm.xlu0 %576, %v307_v11  }
   0xf   :  { %535 = vmatpush3.msra.mxu0 %v34_v10  ;;  %433 = vperm.xlu1 %577, %v429_v27  }
  0x10   :  { %536 = vmatprep.subr.mxu0 %v33_v12 }
  0x11   :  { %537 = vmatpush3.msra.mxu0 %v33_v12 }
  0x12   :  { %538 = vmatprep.subr.mxu0 %v32_v13  ;;  %438 = vperm.xlu0 %576, %v430_v14  }
  0x13   :  { %539 = vmatpush3.msra.mxu0 %v32_v13  ;;  %453 = vperm.xlu1 %577, %v450_v28  }
  0x14   :  { %540 = vmatprep.subr.mxu0 %v31_v15 }
  0x15   :  { %541 = vmatpush3.msra.mxu0 %v31_v15 }
  0x16   :  { %542 = vmatprep.subr.mxu0 %v30_v16 }
  0x17   :  { %543 = vmatpush3.msra.mxu0 %v30_v16 }
  0x18   :  { %545 = vmatmul.mubr.msk.f32.vlgmr.msra.gmra.mxu0 %vm59_vm1, %v42_v17 }
  0x19   :  { %547 = vmatprep.mubr.msk.f32.mxu0 %vm59_vm1, %v43_v18 }
  0x1c   :  { %548 = vmatmul.mubr.msk.f32.gmra.mxu0 %vm59_vm1, %v44_v19 }
  0x1d   :  { %550 = vmatprep.mubr.msk.f32.mxu0 %vm59_vm1, %v45_v20 }
  0x20   :  { %551 = vmatmul.mubr.msk.f32.gmra.mxu0 %vm59_vm1, %v46_v21 }
  0x21   :  { %553 = vmatprep.mubr.msk.f32.mxu0 %vm59_vm1, %v47_v22 }
  0x24   :  { %554 = vmatmul.mubr.msk.f32.gmra.mxu0 %vm59_vm1, %v48_v23 }
  0x85   :  { %v57_v31 = vpop.permute.xlu0 %56 }
  0xd8   :  { %v546_v29 = vpop.f32.mrf.mxu0 }
  0xd9   :  { %v754_v36 = vadd.f32 %v546_v29, %v57_v31 }
  0xda   :  { %v154_v30 = vpop.f32.mrf.mxu0 }
  0xdb   :  { %v759_v40 = vadd.f32 %v154_v30, %v57_v31  ;;  %v202_v45 = vmin.f32 %v754_v36, 20.0  ;;  %vm194_vm1 = vcmp.gt.f32.partialorder %v754_v36, 20.0 }
  0xdc   :  { %v549_v32 = vpop.f32.mrf.mxu0 }
  0xdd   :  { %v750_v33 = vadd.f32 %v549_v32, %v57_v31  ;;  %v201_v51 = vmin.f32 %v759_v40, 20.0  ;;  %v211_v57 = vmul.f32 1.442695, %v202_v45 }
  0xde   :  { %v164_v34 = vpop.f32.mrf.mxu0 }
  0xdf   :  { %v752_v35 = vadd.f32 %v164_v34, %v57_v31  ;;  %v204_v37 = vmin.f32 %v750_v33, 20.0  ;;  %v209_v60 = vmul.f32 1.442695, %v201_v51  ;;  %vm196_vm13 = vcmp.gt.f32.partialorder %v750_v33, 20.0 }
  0xe0   :  { %v552_v38 = vpop.f32.mrf.mxu0 }
  0xe1   :  { %v757_v39 = vadd.f32 %v552_v38, %v57_v31  ;;  %v203_v41 = vmin.f32 %v752_v35, 20.0  ;;  %v215_v46 = vmul.f32 1.442695, %v204_v37  ;;  %vm195_vm15 = vcmp.gt.f32.partialorder %v752_v35, 20.0 }
  0xe2   :  { %v174_v42 = vpop.f32.mrf.mxu0 }
  0xe3   :  { %v206_v43 = vmin.f32 %v757_v39, 20.0  ;;  %v763_v44 = vadd.f32 %v174_v42, %v57_v31  ;;  %v213_v52 = vmul.f32 1.442695, %v203_v41  ;;  %vm198_vm8 = vcmp.gt.f32.partialorder %v757_v39, 20.0 }
  0xe4   :  { %v555_v47 = vpop.f32.mrf.mxu0 }
  0xe5   :  { %v219_v48 = vmul.f32 1.442695, %v206_v43  ;;  %v205_v49 = vmin.f32 %v763_v44, 20.0  ;;  %v767_v50 = vadd.f32 %v555_v47, %v57_v31  ;;  %vm197_vm10 = vcmp.gt.f32.partialorder %v763_v44, 20.0 }
  0xe6   :  { %v184_v53 = vpop.f32.mrf.mxu0 }
  0xe7   :  { %578 = vpow2.f32 %v219_v48  ;;  %v217_v54 = vmul.f32 1.442695, %v205_v49  ;;  %v208_v55 = vmin.f32 %v767_v50, 20.0  ;;  %v771_v56 = vadd.f32 %v184_v53, %v57_v31 }
  0xe8   :  { %580 = vpow2.f32 %v215_v46  ;;  %vm200_vm3 = vcmp.gt.f32.partialorder %v767_v50, 20.0 }
  0xe9   :  { %582 = vpow2.f32 %v217_v54  ;;  %v223_v58 = vmul.f32 1.442695, %v208_v55  ;;  %v207_v59 = vmin.f32 %v771_v56, 20.0  ;;  %vm199_vm4 = vcmp.gt.f32.partialorder %v771_v56, 20.0 }
  0xea   :  { %584 = vpow2.f32 %v213_v52 }
  0xeb   :  { %586 = vpow2.f32 %v223_v58  ;;  %v221_v61 = vmul.f32 1.442695, %v207_v59 }
  0xec   :  { %588 = vpow2.f32 %v211_v57 }
  0xed   :  { %590 = vpow2.f32 %v221_v61 }
  0xee   :  { %592 = vpow2.f32 %v209_v60 }
  0xf4   :  { %v579_v62 = vpop.eup %578 }
  0xf5   :  { %v774_v63 = vpop.eup %580  ;;  %v270_v0 = vadd.f32 1.0, %v579_v62  ;;  %v273_v15 = vmul.f32 -0.5, %v579_v62  ;;  %v276_v29 = vand.u32 2147483647, %v579_v62 }
  0xf6   :  { %v776_v1 = vpop.eup %582  ;;  %v252_v5 = vadd.f32 1.0, %v774_v63  ;;  %v255_v22 = vmul.f32 -0.5, %v774_v63  ;;  %v258_v25 = vand.u32 2147483647, %v774_v63 }
  0xf7   :  { %v778_v2 = vpop.eup %584  ;;  %v261_v3 = vadd.f32 1.0, %v776_v1  ;;  %594 = vlog2.f32 %v270_v0  ;;  %v264_v18 = vmul.f32 -0.5, %v776_v1  ;;  %v274_v21 = vadd.f32 1.0, %v273_v15 }
  0xf8   :  { %v587_v4 = vpop.eup %586  ;;  %v243_v10 = vadd.f32 1.0, %v778_v2  ;;  %v246_v30 = vmul.f32 -0.5, %v778_v2  ;;  %v267_v45 = vand.u32 2147483647, %v776_v1  ;;  %v256_v46 = vadd.f32 1.0, %v255_v22 }
  0xf9   :  { %v782_v6 = vpop.eup %588  ;;  %v288_v7 = vadd.f32 1.0, %v587_v4  ;;  %596 = vlog2.f32 %v261_v3  ;;  %v291_v14 = vmul.f32 -0.5, %v587_v4  ;;  %v294_v20 = vand.u32 2147483647, %v587_v4 }
  0xfa   :  { %v591_v8 = vpop.eup %590  ;;  %v234_v12 = vadd.f32 1.0, %v782_v6  ;;  %v237_v26 = vmul.f32 -0.5, %v782_v6  ;;  %v265_v41 = vadd.f32 1.0, %v264_v18  ;;  %v275_v43 = vmul.f32 %v579_v62, %v274_v21 }
  0xfb   :  { %598 = vlog2.f32 %v288_v7  ;;  %v279_v9 = vadd.f32 1.0, %v591_v8  ;;  %v785_v11 = vpop.eup %592  ;;  %v282_v16 = vmul.f32 -0.5, %v591_v8  ;;  %v292_v17 = vadd.f32 1.0, %v291_v14 }
  0xfc   :  { %600 = vlog2.f32 %v252_v5  ;;  %v225_v13 = vadd.f32 1.0, %v785_v11  ;;  %v285_v28 = vand.u32 2147483647, %v591_v8  ;;  %v228_v31 = vmul.f32 -0.5, %v785_v11 }
  0xfd   :  { %602 = vlog2.f32 %v279_v9  ;;  %v283_v24 = vadd.f32 1.0, %v282_v16  ;;  %v293_v37 = vmul.f32 %v587_v4, %v292_v17  ;;  %vm295_vm5 = vcmp.lt.f32.partialorder %v294_v20, 0.0004427343 }
  0xfe   :  { %604 = vlog2.f32 %v243_v10  ;;  %vm286_vm6 = vcmp.lt.f32.partialorder %v285_v28, 0.0004427343  ;;  %vm801_vm7 = vcmp.lt.f32.partialorder %v276_v29, 0.0004427343  ;;  %v247_v55 = vadd.f32 1.0, %v246_v30 }
  0xff   :  { %606 = vlog2.f32 %v234_v12  ;;  %v284_v49 = vmul.f32 %v591_v8, %v283_v24  ;;  %v266_v59 = vmul.f32 %v776_v1, %v265_v41  ;;  %vm812_vm9 = vcmp.lt.f32.partialorder %v267_v45, 0.0004427343  ;;  %v312_v24 = vpop.permute.xlu0 %311 }
 0x100   :  { %608 = vlog2.f32 %v225_v13  ;;  %v249_v0 = vand.u32 2147483647, %v778_v2  ;;  %v257_v1 = vmul.f32 %v774_v63, %v256_v46  ;;  %v238_v5 = vadd.f32 1.0, %v237_v26 }
 0x101   :  { %vm822_vm11 = vcmp.lt.f32.partialorder %v258_v25, 0.0004427343  ;;  %v240_v9 = vand.u32 2147483647, %v782_v6  ;;  %v248_v63 = vmul.f32 %v778_v2, %v247_v55  ;;  %v229_v13 = vadd.f32 1.0, %v228_v31 }
 0x102   :  { %vm831_vm12 = vcmp.lt.f32.partialorder %v249_v0, 0.0004427343  ;;  %v231_v15 = vand.u32 2147483647, %v785_v11  ;;  %v239_v17 = vmul.f32 %v782_v6, %v238_v5 }
 0x103   :  { %vm241_vm14 = vcmp.lt.f32.partialorder %v240_v9, 0.0004427343  ;;  %v439_v55 = vpop.permute.xlu0 %438 }
 0x104   :  { %v595_v19 = vpop.eup %594  ;;  %vm232_vm0 = vcmp.lt.f32.partialorder %v231_v15, 0.0004427343 }
 0x105   :  { %v272_v38 = vmul.f32 0.6931472, %v595_v19  ;;  %v230_v19 = vmul.f32 %v785_v11, %v229_v13  ;;  %v306_v11 = vld [vmem:[%s860_s3 + $0x8] sm:$0xff] }
 0x106   :  { %v597_v23 = vpop.eup %596 }
 0x107   :  { %v263_v51 = vmul.f32 0.6931472, %v597_v23  ;;  %v278_v58 = vsel %vm801_vm7, %v275_v43, %v272_v38 }
 0x108   :  { %v599_v27 = vpop.eup %598 }
 0x109   :  { %v601_v32 = vpop.eup %600  ;;  %v290_v34 = vmul.f32 0.6931472, %v599_v27  ;;  %v269_v3 = vsel %vm812_vm9, %v266_v59, %v263_v51 }
 0x10a   :  { %v603_v42 = vpop.eup %602  ;;  %v254_v60 = vmul.f32 0.6931472, %v601_v32  ;;  %v301_v14 = vsel %vm197_vm10, %v763_v44, %v269_v3 }
 0x10b   :  { %v296_v47 = vsel %vm295_vm5, %v293_v37, %v290_v34  ;;  %v281_v48 = vmul.f32 0.6931472, %v603_v42  ;;  %v605_v52 = vpop.eup %604 }
 0x10c   :  { %v304_v53 = vsel %vm200_vm3, %v767_v50, %v296_v47  ;;  %v607_v61 = vpop.eup %606  ;;  %v245_v4 = vmul.f32 0.6931472, %v605_v52  ;;  %v260_v10 = vsel %vm822_vm11, %v257_v1, %v254_v60  ;;  %vm193_vm3 = vcmp.gt.f32.partialorder %v759_v40, 20.0 }
 0x10d   :  { %556 = vmatprep.subr.mxu1 %v304_v53  ;;  %v287_v57 = vsel %vm286_vm6, %v284_v49, %v281_v48  ;;  %v609_v7 = vpop.eup %608  ;;  %v236_v12 = vmul.f32 0.6931472, %v607_v61  ;;  %v300_v18 = vsel %vm196_vm13, %v750_v33, %v260_v10  ;;  %v456_v61 = vlaneseq }
 0x10e   :  { %557 = vmatpush3.msra.mxu1 %v304_v53  ;;  %v303_v50 = vsel %vm199_vm4, %v771_v56, %v287_v57  ;;  %v302_v56 = vsel %vm198_vm8, %v757_v39, %v278_v58  ;;  %v251_v16 = vsel %vm831_vm12, %v248_v63, %v245_v4  ;;  %v227_v2 = vmul.f32 0.6931472, %v609_v7 }
 0x10f   :  { %558 = vmatprep.subr.mxu1 %v303_v50  ;;  %v242_v44 = vsel %vm241_vm14, %v239_v17, %v236_v12  ;;  %v299_v20 = vsel %vm195_vm15, %v752_v35, %v251_v16  ;;  %v317_v35 = vpop.permute.xlu1 %316  ;;  %v457_v0 = vshrl.u32 %v456_v61, 7 }
 0x110   :  { %559 = vmatpush3.msra.mxu1 %v303_v50  ;;  %v233_v21 = vsel %vm232_vm0, %v230_v19, %v227_v2  ;;  %v298_v6 = vsel %vm194_vm1, %v754_v36, %v242_v44 }
 0x111   :  { %560 = vmatprep.subr.mxu1 %v302_v56  ;;  %v297_v33 = vsel %vm193_vm3, %v759_v40, %v233_v21  ;;  %v458_v4 = vsub.s32 0, %v457_v0 }
 0x112   :  { %561 = vmatpush3.msra.mxu1 %v302_v56 }
 0x113   :  { %562 = vmatprep.subr.mxu1 %v301_v14  ;;  %v434_v57 = vpop.permute.xlu1 %433 }
 0x114   :  { %563 = vmatpush3.msra.mxu1 %v301_v14 }
 0x115   :  { %564 = vmatprep.subr.mxu1 %v300_v18 }
 0x116   :  { %565 = vmatpush3.msra.mxu1 %v300_v18 }
 0x117   :  { %566 = vmatprep.subr.mxu1 %v299_v20  ;;  %v454_v7 = vpop.permute.xlu1 %453 }
 0x118   :  { %567 = vmatpush3.msra.mxu1 %v299_v20  ;;  %v459_v8 = vrot.slane %v454_v7, %v458_v4 }
 0x119   :  { %568 = vmatprep.subr.mxu1 %v298_v6 }
 0x11a   :  { %569 = vmatpush3.msra.mxu1 %v298_v6 }
 0x11b   :  { %570 = vmatprep.subr.mxu1 %v297_v33 }
 0x11c   :  { %571 = vmatpush3.msra.mxu1 %v297_v33 }
 0x11d   :  { %573 = vmatmul.mubr.msk.f32.vlgmr.msra.gmra.mxu1 %vm319_vm2, %v306_v11 }
 0x1dd   :  { %v574_v22 = vpop.f32.mrf.mxu1 }
 0x1de   :  { %v398_v23 = vadd.f32 %v574_v22, %v317_v35 }
 0x1df   :  { %v392_v25 = vpop.f32.mrf.mxu1 }
 0x1e0   :  { %v404_v36 = vmin.f32 %v398_v23, 20.0  ;;  %v393_v26 = vadd.f32 %v392_v25, %v312_v24  ;;  %vm402_vm4 = vcmp.gt.f32.partialorder %v398_v23, 20.0 }
 0x1e2   :  { %v407_v27 = vmul.f32 1.442695, %v404_v36  ;;  %v403_v28 = vmin.f32 %v393_v26, 20.0  ;;  %vm401_vm6 = vcmp.gt.f32.partialorder %v393_v26, 20.0 }
 0x1e4   :  { %610 = vpow2.f32 %v407_v27  ;;  %v405_v29 = vmul.f32 1.442695, %v403_v28 }
 0x1e6   :  { %612 = vpow2.f32 %v405_v29 }
 0x1f1   :  { %v611_v40 = vpop.eup %610 }
 0x1f2   :  { %v418_v30 = vadd.f32 1.0, %v611_v40  ;;  %v421_v34 = vmul.f32 -0.5, %v611_v40  ;;  %v424_v41 = vand.u32 2147483647, %v611_v40 }
 0x1f3   :  { %v613_v31 = vpop.eup %612 }
 0x1f4   :  { %614 = vlog2.f32 %v418_v30  ;;  %v409_v32 = vadd.f32 1.0, %v613_v31  ;;  %v412_v37 = vmul.f32 -0.5, %v613_v31  ;;  %v422_v38 = vadd.f32 1.0, %v421_v34 }
 0x1f5   :  { %v415_v45 = vand.u32 2147483647, %v613_v31  ;;  %vm425_vm2 = vcmp.lt.f32.partialorder %v424_v41, 0.0004427343 }
 0x1f6   :  { %616 = vlog2.f32 %v409_v32  ;;  %v413_v42 = vadd.f32 1.0, %v412_v37  ;;  %v423_v47 = vmul.f32 %v611_v40, %v422_v38 }
 0x1f7   :  { %vm416_vm5 = vcmp.lt.f32.partialorder %v415_v45, 0.0004427343 }
 0x1f8   :  { %v414_v52 = vmul.f32 %v613_v31, %v413_v42 }
 0x201   :  { %v615_v43 = vpop.eup %614 }
 0x202   :  { %v420_v46 = vmul.f32 0.6931472, %v615_v43 }
 0x203   :  { %v617_v48 = vpop.eup %616 }
 0x204   :  { %v426_v49 = vsel %vm425_vm2, %v423_v47, %v420_v46  ;;  %v411_v51 = vmul.f32 0.6931472, %v617_v48 }
 0x205   :  { %v428_v53 = vsel %vm402_vm4, %v398_v23, %v426_v49 }
 0x206   :  { %v417_v54 = vsel %vm416_vm5, %v414_v52, %v411_v51  ;;  %v442_v59 = vmul.f32 %v439_v55, %v428_v53 }
 0x207   :  { %v427_v58 = vsel %vm401_vm6, %v393_v26, %v417_v54 }
 0x208   :  { %v441_v60 = vmul.f32 %v434_v57, %v427_v58 }
 0x20a   :  { %v443_v50 = vadd.f32 %v442_v59, %v441_v60 }
 0x20c   :  { %v444_v62 = vrot.slane %v443_v50, 4 }
 0x20e   :  { %v445_v3 = vadd.f32 %v444_v62, %v443_v50 }
 0x210   :  { %v446_v1 = vrot.slane %v445_v3, 2 }
 0x212   :  { %v447_v5 = vadd.f32 %v446_v1, %v445_v3 }
 0x214   :  { %v448_v56 = vrot.slane %v447_v5, 1 }
 0x216   :  { %v449_v9 = vadd.f32 %v448_v56, %v447_v5 }
 0x218   :  { %v460_v10 = vadd.f32 %v459_v8, %v449_v9 }
 0x21a   :  { %v462_v63 = vmin.f32 %v460_v10, 20.0  ;;  %vm461_vm8 = vcmp.gt.f32.partialorder %v460_v10, 20.0 }
 0x21c   :  { %v463_v12 = vmul.f32 1.442695, %v462_v63 }
 0x21e   :  { %618 = vpow2.f32 %v463_v12 }
 0x22b   :  { %v619_v13 = vpop.eup %618 }
 0x22c   :  { %v465_v14 = vadd.f32 1.0, %v619_v13  ;;  %v468_v39 = vmul.f32 -0.5, %v619_v13  ;;  %v471_v16 = vand.u32 2147483647, %v619_v13 }
 0x22e   :  { %620 = vlog2.f32 %v465_v14  ;;  %v469_v15 = vadd.f32 1.0, %v468_v39  ;;  %vm472_vm7 = vcmp.lt.f32.partialorder %v471_v16, 0.0004427343 }
 0x230   :  { %v470_v18 = vmul.f32 %v619_v13, %v469_v15 }
 0x23b   :  { %v621_v17 = vpop.eup %620 }
 0x23c   :  { %v467_v2 = vmul.f32 0.6931472, %v621_v17 }
 0x23e   :  { %v473_v44 = vsel %vm472_vm7, %v470_v18, %v467_v2 }
 0x23f   :  { %v474_v19 = vsel %vm461_vm8, %v460_v10, %v473_v44 }
 0x240   :  { %v475_v20 = vmul.f32 1e+08, %v474_v19 }
 0x242   :  { %476 = vst [vmem:[%s862_s7] sm:$0x1] %v475_v20 }

</bundles_post_ra>
